<compile_context>
chip_gen: v7x
topology: tpu7x:2x2x1
jax: 0.10.0
libtpu: 0.0.40
codegen_flags: <defaults>
</compile_context>

<pallas_src>
import jax
import jax.numpy as jnp
from jax.experimental import pallas as pl
from jax.experimental.pallas import tpu as pltpu


def _round_up(x, m):
    return ((x + m - 1) // m) * m


# ----------------------------------------------------------------------------
# Pallas kernel: K-tiled (patches @ W) -> f32 acc; last K step adds bias +
# residual and applies ReLU.
# ----------------------------------------------------------------------------
def _fused_kernel(p_ref, w_ref, bias_ref, x2_ref, o_ref, acc_ref):
    k = pl.program_id(1)

    @pl.when(k == 0)
    def _():
        acc_ref[...] = jnp.zeros_like(acc_ref)

    acc_ref[...] += jnp.dot(p_ref[...], w_ref[...],
                            preferred_element_type=jnp.float32)

    @pl.when(k == pl.num_programs(1) - 1)
    def _():
        y = acc_ref[...] + bias_ref[...] + x2_ref[...].astype(jnp.float32)
        o_ref[...] = jnp.maximum(y, 0.0).astype(o_ref.dtype)


# ----------------------------------------------------------------------------
# JAX glue: bilinear sampling with per-corner zero padding
# (matches torchvision.ops.deform_conv2d).
# ----------------------------------------------------------------------------
def _bilinear_sample(x_nhwc, py, px):
    """x_nhwc: (N,H,W,C); py/px: (N,Ho,Wo) float sampling coords."""
    N, H, W, C = x_nhwc.shape
    Ho, Wo = py.shape[1], py.shape[2]
    y0 = jnp.floor(py)
    x0 = jnp.floor(px)
    ly = py - y0
    lx = px - x0
    hy = 1.0 - ly
    hx = 1.0 - lx
    x_flat = x_nhwc.reshape(N, H * W, C)

    def corner(yi, xi):
        valid = (yi >= 0) & (yi <= H - 1) & (xi >= 0) & (xi <= W - 1)
        yc = jnp.clip(yi, 0, H - 1).astype(jnp.int32)
        xc = jnp.clip(xi, 0, W - 1).astype(jnp.int32)
        idx = (yc * W + xc).reshape(N, Ho * Wo, 1)
        g = jnp.take_along_axis(x_flat, idx, axis=1)          # (N,Ho*Wo,C)
        g = g.reshape(N, Ho, Wo, C)
        return jnp.where(valid[..., None], g, 0.0)

    v00 = corner(y0, x0)
    v01 = corner(y0, x0 + 1.0)
    v10 = corner(y0 + 1.0, x0)
    v11 = corner(y0 + 1.0, x0 + 1.0)
    return ((hy * hx)[..., None] * v00 + (hy * lx)[..., None] * v01
            + (ly * hx)[..., None] * v10 + (ly * lx)[..., None] * v11)


def _deform_im2col_bf16(x, offset, mask, KH, KW, stride, padding, dilation,
                        offset_groups):
    """Deformable im2col in bf16: (N*Ho*Wo, KH*KW*Cin), tap-major column order
    matching weight.transpose(2,3,1,0).reshape(KH*KW*Cin, Cout)."""
    N, Cin, H, W = x.shape
    Ho = (H + 2 * padding - dilation * (KH - 1) - 1) // stride + 1
    Wo = (W + 2 * padding - dilation * (KW - 1) - 1) // stride + 1
    K = KH * KW
    G = offset_groups
    assert Cin % G == 0
    Cg = Cin // G
    x_nhwc = jnp.transpose(x, (0, 2, 3, 1))                    # (N,H,W,Cin)

    base_y = (jnp.arange(Ho, dtype=jnp.float32) * stride - padding)[None, :, None]
    base_x = (jnp.arange(Wo, dtype=jnp.float32) * stride - padding)[None, None, :]

    # TODO(synk): data-dependent bilinear gather per output pixel stays as JAX
    # glue (in-kernel would need manual DMA gathers via scalar-prefetched
    # indices); a per-tap-accumulation grid (KH*KW as reduction axis) that
    # avoids the 9x im2col inflation is a further structural option.
    cols = []
    for kh in range(KH):
        for kw in range(KW):
            k = kh * KW + kw
            per_group = []
            for g in range(G):
                off_y = offset[:, 2 * (g * K + k), :, :]
                off_x = offset[:, 2 * (g * K + k) + 1, :, :]
                py = base_y + kh * dilation + off_y            # (N,Ho,Wo)
                px = base_x + kw * dilation + off_x
                samp = _bilinear_sample(
                    x_nhwc[..., g * Cg:(g + 1) * Cg], py, px)  # (N,Ho,Wo,Cg)
                if mask is not None:
                    samp = samp * mask[:, g * K + k, :, :][..., None]
                per_group.append(samp.astype(jnp.bfloat16))    # bf16 here
            cols.append(jnp.concatenate(per_group, axis=-1))   # (N,Ho,Wo,Cin)
    patches = jnp.concatenate(cols, axis=-1)                   # (N,Ho,Wo,K*Cin)
    return patches.reshape(N * Ho * Wo, K * Cin), Ho, Wo


def _choose_tiles(M, Kdim, Cout, tile_m, tile_k):
    Cp = _round_up(Cout, 128)
    Kp0 = _round_up(Kdim, 128)
    tile_k = min(_round_up(tile_k, 128), Kp0)
    Kp = _round_up(Kdim, tile_k)
    tile_m = min(_round_up(tile_m, 16), _round_up(M, 16))
    # Prefer >= 2 M tiles so the "parallel" M axis shards across both
    # TensorCores on v7x (no-op on single-TC v5e/v6e).
    if M > 16 and _round_up(M, tile_m) // tile_m < 2:
        tile_m = _round_up((M + 1) // 2, 16)
    Mp = _round_up(M, tile_m)
    return tile_m, tile_k, Mp, Kp, Cp


# ----------------------------------------------------------------------------
# Wrapper: relu(deform_conv2d(x, offset, mask) + x2), NCHW in / NCHW out.
# ----------------------------------------------------------------------------
def deform_conv_add_relu_2d(x, offset, mask, x2, weight, bias, *,
                            stride=1, padding=1, dilation=1, offset_groups=1,
                            tile_m=512, tile_k=512):
    N, Cin, H, W = x.shape
    Cout, _, KH, KW = weight.shape

    patches, Ho, Wo = _deform_im2col_bf16(x, offset, mask, KH, KW, stride,
                                          padding, dilation, offset_groups)
    M, Kdim = patches.shape
    tile_m, tile_k, Mp, Kp, Cp = _choose_tiles(M, Kdim, Cout, tile_m, tile_k)

    # lane-dense / tile-padded operands (single pad pass, no f32 round trip)
    patches_p = jnp.pad(patches, ((0, Mp - M), (0, Kp - Kdim)))
    w_mat = jnp.transpose(weight, (2, 3, 1, 0)).reshape(Kdim, Cout)
    w_p = jnp.pad(w_mat.astype(jnp.bfloat16),
                  ((0, Kp - Kdim), (0, Cp - Cout)))
    bias_p = jnp.pad(bias.astype(jnp.float32).reshape(1, Cout),
                     ((0, 0), (0, Cp - Cout)))
    x2_flat = jnp.transpose(x2, (0, 2, 3, 1)).reshape(M, Cout)
    x2_p = jnp.pad(x2_flat.astype(jnp.bfloat16),
                   ((0, Mp - M), (0, Cp - Cout)))

    grid = (Mp // tile_m, Kp // tile_k)
    cost = pl.CostEstimate(
        flops=2 * Mp * Kp * Cp + 3 * Mp * Cp,
        transcendentals=0,
        bytes_accessed=(Mp * Kp * 2 + Kp * Cp * 2 + Mp * Cp * 2
                        + Mp * Cp * 4 + Cp * 4),
    )

    out_p = pl.pallas_call(
        _fused_kernel,
        out_shape=jax.ShapeDtypeStruct((Mp, Cp), jnp.float32),
        grid_spec=pltpu.PrefetchScalarGridSpec(
            num_scalar_prefetch=0,
            grid=grid,
            in_specs=[
                pl.BlockSpec((tile_m, tile_k), lambda i, k: (i, k)),  # patches
                pl.BlockSpec((tile_k, Cp), lambda i, k: (k, 0)),      # weights
                pl.BlockSpec((1, Cp), lambda i, k: (0, 0)),           # bias
                pl.BlockSpec((tile_m, Cp), lambda i, k: (i, 0)),      # residual
            ],
            out_specs=pl.BlockSpec((tile_m, Cp), lambda i, k: (i, 0)),
            scratch_shapes=[pltpu.VMEM((tile_m, Cp), jnp.float32)],
        ),
        compiler_params=pltpu.CompilerParams(
            dimension_semantics=("parallel", "arbitrary"),
            vmem_limit_bytes=48 * 1024 * 1024),
        cost_estimate=cost,
    )(patches_p, w_p, bias_p, x2_p)

    # Back to NCHW (module semantics).  TODO(synk): callers that can consume
    # NHWC / padded-Cout directly can skip this slice + transpose HBM pass.
    out = out_p[:M, :Cout].reshape(N, Ho, Wo, Cout).transpose(0, 3, 1, 2)
    return out


# ----------------------------------------------------------------------------
# Pure-JAX reference (per-tap accumulation, f32 throughout).
# ----------------------------------------------------------------------------
def _reference(x, offset, mask, x2, weight, bias, *, stride=1, padding=1,
               dilation=1, offset_groups=1):
    N, Cin, H, W = x.shape
    Cout, _, KH, KW = weight.shape
    Ho = (H + 2 * padding - dilation * (KH - 1) - 1) // stride + 1
    Wo = (W + 2 * padding - dilation * (KW - 1) - 1) // stride + 1
    K = KH * KW
    G = offset_groups
    Cg = Cin // G
    x_nhwc = jnp.transpose(x, (0, 2, 3, 1))
    base_y = (jnp.arange(Ho, dtype=jnp.float32) * stride - padding)[None, :, None]
    base_x = (jnp.arange(Wo, dtype=jnp.float32) * stride - padding)[None, None, :]

    y = jnp.zeros((N, Ho, Wo, Cout), jnp.float32)
    for kh in range(KH):
        for kw in range(KW):
            k = kh * KW + kw
            for g in range(G):
                off_y = offset[:, 2 * (g * K + k), :, :]
                off_x = offset[:, 2 * (g * K + k) + 1, :, :]
                py = base_y + kh * dilation + off_y
                px = base_x + kw * dilation + off_x
                samp = _bilinear_sample(x_nhwc[..., g * Cg:(g + 1) * Cg], py, px)
                if mask is not None:
                    samp = samp * mask[:, g * K + k, :, :][..., None]
                w_tap = weight[:, g * Cg:(g + 1) * Cg, kh, kw]  # (Cout, Cg)
                y = y + jnp.einsum('nhwc,oc->nhwo', samp, w_tap)
    y = y + bias[None, None, None, :] + jnp.transpose(x2, (0, 2, 3, 1))
    y = jnp.maximum(y, 0.0)
    return jnp.transpose(y, (0, 3, 1, 2))


if __name__ == "__main__":
    key = jax.random.PRNGKey(0)
    ks = jax.random.split(key, 6)

    N, Cin, H, W = 2, 4, 16, 16
    Cout, KH, KW = 8, 3, 3
    stride = padding = dilation = 1
    offset_groups = 1
    Ho = (H + 2 * padding - dilation * (KH - 1) - 1) // stride + 1
    Wo = (W + 2 * padding - dilation * (KW - 1) - 1) // stride + 1

    x = jax.random.normal(ks[0], (N, Cin, H, W), dtype=jnp.float32)
    offset = 0.5 * jax.random.normal(
        ks[1], (N, 2 * offset_groups * KH * KW, Ho, Wo), dtype=jnp.float32)
    mask = jax.nn.sigmoid(jax.random.normal(
        ks[2], (N, offset_groups * KH * KW, Ho, Wo), dtype=jnp.float32))
    x2 = jax.random.normal(ks[3], (N, Cout, Ho, Wo), dtype=jnp.float32)
    weight = 0.1 * jax.random.normal(ks[4], (Cout, Cin, KH, KW), dtype=jnp.float32)
    bias = 0.1 * jax.random.normal(ks[5], (Cout,), dtype=jnp.float32)

    out = deform_conv_add_relu_2d(
        x, offset, mask, x2, weight, bias,
        stride=stride, padding=padding, dilation=dilation,
        offset_groups=offset_groups)
    out = jax.block_until_ready(out)

    ref = _reference(x, offset, mask, x2, weight, bias,
                     stride=stride, padding=padding, dilation=dilation,
                     offset_groups=offset_groups)

    assert out.shape == (N, Cout, Ho, Wo)
    err = float(jnp.max(jnp.abs(out - ref)))
    assert err < 5e-2, f"mismatch vs reference: max abs err = {err}"

    print("KERNEL_OK")
</pallas_src>

<mosaic_0001>
module attributes {stable_mosaic.version = 11 : i64} {
  func.func @_fused_kernel(%arg0: i32, %arg1: i32, %arg2: memref<256x128xbf16, #tpu.memory_space<vmem>>, %arg3: memref<128x128xbf16, #tpu.memory_space<vmem>>, %arg4: memref<1x128xf32, #tpu.memory_space<vmem>>, %arg5: memref<256x128xbf16, #tpu.memory_space<vmem>>, %arg6: memref<256x128xf32, #tpu.memory_space<vmem>>, %arg7: memref<256x128xf32, #tpu.memory_space<vmem>>) attributes {dimension_semantics = [#tpu.dimension_semantics<parallel>, #tpu.dimension_semantics<arbitrary>], iteration_bounds = array<i64: 2, 1>, scalar_prefetch = 0 : i64, scratch_operands = 1 : i64, tpu.core_type = #tpu.core_type<tc>, window_params = [{transform_indices = @transform_0, window_bounds = array<i64: 256, 128>}, {transform_indices = @transform_1, window_bounds = array<i64: 128, 128>}, {pipeline_mode = #tpu.pipeline_mode<synchronous>, transform_indices = @transform_2, window_bounds = array<i64: 1, 128>}, {transform_indices = @transform_3, window_bounds = array<i64: 256, 128>}, {transform_indices = @transform_4, window_bounds = array<i64: 256, 128>}]} {
    %c0_i32 = arith.constant 0 : i32
    %0 = arith.cmpi eq, %arg1, %c0_i32 : i32
    %1 = arith.extui %0 : i1 to i32
    %c0_i32_0 = arith.constant 0 : i32
    %2 = arith.cmpi ne, %1, %c0_i32_0 : i32
    scf.if %2 {
      %cst_10 = arith.constant 0.000000e+00 : f32
      %12 = vector.broadcast %cst_10 : f32 to vector<256x128xf32>
      %c0_11 = arith.constant 0 : index
      %c0_12 = arith.constant 0 : index
      %13 = vector.load %arg7[%c0_11, %c0_12] : memref<256x128xf32, #tpu.memory_space<vmem>>, vector<256x128xf32>
      tpu.vector_store %arg7[%c0_11, %c0_12], %12 {strides = array<i32>} : memref<256x128xf32, #tpu.memory_space<vmem>>, vector<256x128xf32>,
    } else {
    }
    %c0 = arith.constant 0 : index
    %c0_1 = arith.constant 0 : index
    %3 = vector.load %arg7[%c0, %c0_1] : memref<256x128xf32, #tpu.memory_space<vmem>>, vector<256x128xf32>
    %c0_2 = arith.constant 0 : index
    %c0_3 = arith.constant 0 : index
    %4 = vector.load %arg2[%c0_2, %c0_3] : memref<256x128xbf16, #tpu.memory_space<vmem>>, vector<256x128xbf16>
    %c0_4 = arith.constant 0 : index
    %c0_5 = arith.constant 0 : index
    %5 = vector.load %arg3[%c0_4, %c0_5] : memref<128x128xbf16, #tpu.memory_space<vmem>>, vector<128x128xbf16>
    %cst = arith.constant dense<0.000000e+00> : vector<256x128xf32>
    %6 = tpu.matmul %4, %5, %cst {dimension_numbers = #tpu.dot_dimension_numbers<[1], [0], [0], [1], [0, 0, 1, 1], [], []>} : vector<256x128xbf16>, vector<128x128xbf16>, vector<256x128xf32> -> vector<256x128xf32>
    %7 = arith.addf %3, %6 : vector<256x128xf32>
    %c0_6 = arith.constant 0 : index
    %c0_7 = arith.constant 0 : index
    %8 = vector.load %arg7[%c0_6, %c0_7] : memref<256x128xf32, #tpu.memory_space<vmem>>, vector<256x128xf32>
    tpu.vector_store %arg7[%c0_6, %c0_7], %7 {strides = array<i32>} : memref<256x128xf32, #tpu.memory_space<vmem>>, vector<256x128xf32>,
    %c0_i32_8 = arith.constant 0 : i32
    %9 = arith.cmpi eq, %arg1, %c0_i32_8 : i32
    %10 = arith.extui %9 : i1 to i32
    %c0_i32_9 = arith.constant 0 : i32
    %11 = arith.cmpi ne, %10, %c0_i32_9 : i32
    scf.if %11 {
      %c0_10 = arith.constant 0 : index
      %c0_11 = arith.constant 0 : index
      %12 = vector.load %arg7[%c0_10, %c0_11] : memref<256x128xf32, #tpu.memory_space<vmem>>, vector<256x128xf32>
      %c0_12 = arith.constant 0 : index
      %c0_13 = arith.constant 0 : index
      %13 = vector.load %arg4[%c0_12, %c0_13] : memref<1x128xf32, #tpu.memory_space<vmem>>, vector<1x128xf32>
      %14 = vector.broadcast %13 : vector<1x128xf32> to vector<256x128xf32>
      %15 = arith.addf %12, %14 : vector<256x128xf32>
      %c0_14 = arith.constant 0 : index
      %c0_15 = arith.constant 0 : index
      %16 = vector.load %arg5[%c0_14, %c0_15] : memref<256x128xbf16, #tpu.memory_space<vmem>>, vector<256x128xbf16>
      %17 = arith.extf %16 : vector<256x128xbf16> to vector<256x128xf32>
      %18 = arith.addf %15, %17 : vector<256x128xf32>
      %cst_16 = arith.constant 0.000000e+00 : f32
      %19 = vector.broadcast %cst_16 : f32 to vector<256x128xf32>
      %20 = arith.maximumf %18, %19 : vector<256x128xf32>
      %c0_17 = arith.constant 0 : index
      %c0_18 = arith.constant 0 : index
      %21 = vector.load %arg6[%c0_17, %c0_18] : memref<256x128xf32, #tpu.memory_space<vmem>>, vector<256x128xf32>
      tpu.vector_store %arg6[%c0_17, %c0_18], %20 {strides = array<i32>} : memref<256x128xf32, #tpu.memory_space<vmem>>, vector<256x128xf32>,
    } else {
    }
    return
  }
  func.func @transform_0(%arg0: i32, %arg1: i32) -> (i32, i32) {
    %c0_i32 = arith.constant 0 : i32
    return %arg0, %arg1 : i32, i32
  }
  func.func @transform_1(%arg0: i32, %arg1: i32) -> (i32, i32) {
    %c0_i32 = arith.constant 0 : i32
    %c0_i32_0 = arith.constant 0 : i32
    return %arg1, %c0_i32 : i32, i32
  }
  func.func @transform_2(%arg0: i32, %arg1: i32) -> (i32, i32) {
    %c0_i32 = arith.constant 0 : i32
    %c0_i32_0 = arith.constant 0 : i32
    %c0_i32_1 = arith.constant 0 : i32
    return %c0_i32, %c0_i32_0 : i32, i32
  }
  func.func @transform_3(%arg0: i32, %arg1: i32) -> (i32, i32) {
    %c0_i32 = arith.constant 0 : i32
    %c0_i32_0 = arith.constant 0 : i32
    return %arg0, %c0_i32 : i32, i32
  }
  func.func @transform_4(%arg0: i32, %arg1: i32) -> (i32, i32) {
    %c0_i32 = arith.constant 0 : i32
    %c0_i32_0 = arith.constant 0 : i32
    return %arg0, %c0_i32 : i32, i32
  }
}

</mosaic_0001>

<bundles_post_ra>
// kernel: tpu_custom_call.1
= control target key start
LH: loop header
LB: loop body
LE: loop exit
PB: predicated region body
PF: predicated region fallthrough
CT: control target
= control target key end

     0   :  { %9 = vsyncpa [#allocation4], 0  ;;  %s2064_s0 = inlined_call_operand.hbm [shape: bf16[512,128], index: 0, kind: input, shape index: {}]   ;;  %s2065_s1 = inlined_call_operand.hbm [shape: bf16[128,128], index: 1, kind: input, shape index: {}]   ;;  %s2066_s2 = inlined_call_operand.vmem [shape: f32[1,128], index: 2, kind: input, shape index: {}]   ;;  %s2067_s3 = inlined_call_operand.hbm [shape: bf16[512,128], index: 3, kind: input, shape index: {}]   ;;  %s2068_s4 = inlined_call_operand.hbm [shape: f32[512,128], index: 4, kind: output, shape index: {}]  }
   0x1   :  { %11 = vsyncpa [#allocation4 + $0x1], 0 }
   0x2   :  { %12 = vsyncpa [#allocation7], 0 }
   0x3   :  { %13 = vsyncpa [#allocation5], 0 }
   0x4   :  { %15 = vsyncpa [#allocation5 + $0x1], 0  ;;  %s1679_s15 = smov 0   ;;  %s1681_s16 = smov 0  }
   0x5   :  { %s1683_s17 = smov 0   ;;  %s1685_s18 = smov 0  }
   0x6   :  { %s1687_s19 = smov 0   ;;  %s1689_s20 = smov 0  }
   0x7 LB: > { %s33_s21 = sadd.s32 1, %s1640_s19  ;;  %s42_s22 = sadd.s32 1, %s1632_s17  ;;  %s1644_s20 = sphi %s1689_s20, %s21_s20   ;;  %s1640_s19 = sphi %s1687_s19, %s2096_s19   ;;  %s1636_s18 = sphi %s1685_s18, %s2095_s18   ;;  %s1632_s17 = sphi %s1683_s17, %s2094_s17   ;;  %s1628_s16 = sphi %s1681_s16, %s2093_s16   ;;  %s1624_s15 = sphi %s1679_s15, %s2092_s15  }
   0x8   : > { %p35_p0 = scmp.ge.s32.totalorder %s33_s21, 2  ;;  %p49_p1 = scmp.ne.s32.totalorder %s1632_s17, %s1628_s16 }
   0x9   : > { %p50_p2 = scmp.eq.s32.totalorder %s1644_s20, 0  ;;  %p1386_p6 = scmp.lt.s32.totalorder %s1644_s20, 2 }
   0xa   : > { %s2098_s21 = smov (%p35_p0, %s33_s21), 0  ;;  %s197_s25 = sand.u32 1, %s1644_s20  }
   0xb   : > { %p1719_p3 = por %p50_p2, %p49_p1  ;;  %s37_s24 = ssub.s32 %s1640_s19, %s2098_s21 }
   0xc   : > { %p40_p5 = scmp.eq.s32.totalorder %s37_s24, 0  ;;  %s199_s26 = sand.u32 1, %s1632_s17  }
   0xd   : > { %s1732_s28 = sshll.u32 %s199_s26, 7  ;;  %s1190_s29 = sshll.u32 %s1640_s19, 11 }
   0xe   : > { %s1730_s27 = scalar_select %p40_p5, %s1632_s17, %s42_s22  }
   0xf   : > { %s1738_s6 = scalar_lea.hbm %s2064_s0, %s1190_s29  ;;  %s201_s7 = scalar_lea.vmem [#allocation3], %s1732_s28 }
  0x10   : > { %s209_s8 = sshll.u32 %s201_s7, 4  ;;  %p1745_p7 = pnand %p1386_p6, %p1719_p3  ;;  %s1741_s8 = int_to_ptr.vmem [resolvable:$true] %s209_s8 }
  0x11   : > { %s1752_s12 = scalar_lea.hbm %s2067_s3, %s1190_s29  ;;  %s1754_s13 = scalar_lea.sflag [#allocation4], %s197_s25 }
  0x12   : > { %s1466_s14 = scalar_lea.hbm %s1738_s6, 2048  ;;  %p1468_p9 = pneg %p1745_p7 }
  0x13   : > { %p1467_p8 = scmp.ne.s32.totalorder %s1738_s6, %s1466_s14  ;;  %s1471_s24 = scalar_lea.hbm %s2064_s0, 4096 }
  0x14   : > { %p1472_p12 = scmp.lt.u32.totalorder %s1738_s6, %s2064_s0  ;;  %p1473_p13 = scmp.lt.u32.totalorder %s1471_s24, %s1466_s14 }
  0x15   : > { %p1469_p10 = pnand %p1468_p9, %p1467_p8  ;;  %p1475_p2 = scmp.lt.u32.totalorder %s1466_s14, %s1738_s6 }
  0x16   : > { %p1474_p0 = por %p1473_p13, %p1472_p12 }
  0x17   : > { %p1470_p11 = pneg %p1469_p10 }
  0x18   : > { %p1476_p3 = por %p1475_p2, %p1474_p0 }
  0x1a   : > { %p1477_p5 = pnand %p1476_p3, %p1470_p11 }
  0x1c   : > { %1480 = shalt.err (!%p1477_p5)
}
  0x1d   : > { %s1481_s25 = scalar_lea.vmem %s1741_s8, 2048  ;;  %s1646_s29 = smov [#allocation3]  }
  0x1e   : > { %p1482_p6 = scmp.ne.s32.totalorder %s1741_s8, %s1481_s25  ;;  %s1486_s5 = sshll.u32 %s1646_s29, 4  ;;  %s1487_s5 = int_to_ptr.vmem [resolvable:$false] %s1486_s5 }
  0x1f   : > { %s1488_s7 = scalar_lea.vmem %s1487_s5, 4096  ;;  %p1489_p4 = scmp.lt.s32.totalorder %s1741_s8, %s1487_s5 }
  0x20   : > { %p1484_p8 = pnand %p1482_p6, %p1468_p9  ;;  %p1490_p12 = scmp.lt.s32.totalorder %s1488_s7, %s1481_s25 }
  0x22   : > { %p1485_p10 = pneg %p1484_p8  ;;  %p1491_p13 = por %p1490_p12, %p1489_p4 }
  0x24   : > { %p1492_p0 = pnand %p1491_p13, %p1485_p10 }
  0x26   : > { %1495 = shalt.err (!%p1492_p0)
}
  0x27   : > { %s2069_s10 = smov 64   ;;  %s1648_s11 = smov 4  }
  0x28   : > { %1377 = dma.hbm_to_vmem [thread:$0]  (!%p1745_p7), %s1738_s6, 2048, %s1741_s8, %s1754_s13, %s2069_s10, %s2069_s10, %s1648_s11  }
  0x29   : > { %s223_s14 = scalar_lea.vmem [#allocation8], %s1732_s28  ;;  %s1787_s23 = sadd.s32 4294967295, %s1644_s20  }
  0x2a   : > { %s230_s22 = sshll.u32 %s223_s14, 4  ;;  %s1145_s24 = sadd.s32 4294967294, %s1644_s20   ;;  %s1813_s22 = int_to_ptr.vmem [resolvable:$true] %s230_s22 }
  0x2b   : > { %p55_p4 = scmp.ne.s32.totalorder %s1628_s16, %s1624_s15  ;;  %p2071_p11 = scmp.eq.s32.totalorder %s1787_s23, 0 }
  0x2c   : > { %p152_p2 = scmp.eq.s32.totalorder %s1787_s23, 1  ;;  %p158_p3 = scmp.eq.s32.totalorder %s1145_s24, 1 }
  0x2d   : > { %p1146_p5 = scmp.ge.s32.totalorder %s1644_s20, 1  ;;  %p1797_p6 = por %p2071_p11, %p55_p4 }
  0x2e   : > { %p1804_p8 = por %p152_p2, %p49_p1  ;;  %p1808_p10 = por %p158_p3, %p55_p4 }
  0x2f   : > { %s2077_s6 = scalar_select %p1797_p6, 1, 0 }
  0x30   : > { %s2078_s28 = scalar_select %p1804_p8, 1, 0 }
  0x31   : > { %s2079_s8 = scalar_select %p1808_p10, 1, 0 }
  0x32   : > { %p165_p12 = scmp.lt.s32.totalorder %s1644_s20, 3  ;;  %s1649_s30 = smov [#allocation6]  }
  0x33   : > { %s1819_s25 = sshll.u32 %s1649_s30, 4  ;;  %s1496_s29 = scalar_lea.hbm %s1752_s12, 2048  ;;  %s181_s25 = int_to_ptr.vmem [resolvable:$true] %s1819_s25 }
  0x34   : > { %p1815_p13 = pnand %p1146_p5, %p165_p12  ;;  %p1497_p0 = scmp.ne.s32.totalorder %s1752_s12, %s1496_s29 }
  0x35   : > { %s1501_s14 = scalar_lea.hbm %s2067_s3, 4096  ;;  %p1502_p3 = scmp.lt.u32.totalorder %s1752_s12, %s2067_s3 }
  0x36   : > { %s2080_s26 = scalar_select %p1815_p13, 1, 0 }
  0x37   : > { %p1499_p4 = pnand %p1497_p0, %p1468_p9  ;;  %p1503_p5 = scmp.lt.u32.totalorder %s1501_s14, %s1496_s29 }
  0x38   : > { %p1505_p11 = scmp.lt.u32.totalorder %s1496_s29, %s1752_s12 }
  0x39   : > { %p1500_p2 = pneg %p1499_p4  ;;  %p1504_p12 = por %p1503_p5, %p1502_p3 }
  0x3b   : > { %p1506_p10 = por %p1505_p11, %p1504_p12 }
  0x3d   : > { %p1507_p8 = pnand %p1506_p10, %p1500_p2 }
  0x3f   : > { %1510 = shalt.err (!%p1507_p8)
}
  0x40   : > { %s1511_s30 = scalar_lea.vmem %s1813_s22, 2048  ;;  %s1650_s5 = smov [#allocation8]  }
  0x41   : > { %p1512_p0 = scmp.ne.s32.totalorder %s1813_s22, %s1511_s30  ;;  %s1516_s7 = sshll.u32 %s1650_s5, 4  ;;  %s1517_s7 = int_to_ptr.vmem [resolvable:$false] %s1516_s7 }
  0x42   : > { %s1518_s10 = scalar_lea.vmem %s1517_s7, 4096  ;;  %p1519_p6 = scmp.lt.s32.totalorder %s1813_s22, %s1517_s7 }
  0x43   : > { %p1514_p4 = pnand %p1512_p0, %p1468_p9  ;;  %p1520_p3 = scmp.lt.s32.totalorder %s1518_s10, %s1511_s30 }
  0x45   : > { %p1515_p1 = pneg %p1514_p4  ;;  %p1521_p5 = por %p1520_p3, %p1519_p6 }
  0x47   : > { %p1522_p11 = pnand %p1521_p5, %p1515_p1 }
  0x49   : > { %1525 = shalt.err (!%p1522_p11)
}
  0x4a   : > { %s2081_s29 = smov 64   ;;  %p2082_p9 = scmp.eq.s32.totalorder %s1787_s23, 0 }
  0x4b   : > { %1380 = dma.hbm_to_vmem [thread:$0]  (!%p1745_p7), %s1752_s12, 2048, %s1813_s22, %s1754_s13, %s2081_s29, %s2081_s29, %s1648_s11  }
  0x4c   : > { %p2083_p8 = pneg %p1815_p13  ;;  %s1526_s30 = scalar_lea.hbm %s2065_s1, 1024 }
  0x4d   : > { %p1527_p6 = scmp.ne.s32.totalorder %s2065_s1, %s1526_s30  ;;  %p1533_p12 = scmp.lt.u32.totalorder %s1526_s30, %s2065_s1 }
  0x4e   : > { %p1856_p10 = pnand %p2083_p8, %p2082_p9 }
  0x50   : > { %p1528_p1 = pneg %p1856_p10 }
  0x52   : > { %p1529_p7 = pnand %p1528_p1, %p1527_p6 }
  0x54   : > { %p1530_p2 = pneg %p1529_p7 }
  0x56   : > { %p1535_p0 = pnand %p1533_p12, %p1530_p2 }
  0x58   : > { %1538 = shalt.err (!%p1535_p0)
}
  0x59   : > { %s1539_s22 = scalar_lea.vmem %s181_s25, 1024  ;;  %p1547_p11 = scmp.lt.s32.totalorder %s181_s25, %s181_s25 }
  0x5a   : > { %p1540_p4 = scmp.ne.s32.totalorder %s181_s25, %s1539_s22  ;;  %p1548_p9 = scmp.lt.s32.totalorder %s1539_s22, %s1539_s22 }
  0x5c   : > { %p1542_p3 = pnand %p1540_p4, %p1528_p1  ;;  %p1549_p8 = por %p1548_p9, %p1547_p11 }
  0x5e   : > { %p1543_p5 = pneg %p1542_p3 }
  0x60   : > { %p1550_p13 = pnand %p1549_p8, %p1543_p5 }
  0x62   : > { %1553 = shalt.err (!%p1550_p13)
}
  0x63   : > { %1373 = dma.hbm_to_vmem [thread:$0]  (!%p1856_p10), %s2065_s1, 1024, %s181_s25, [#allocation7], %s2081_s29, %s2081_s29, %s1648_s11  }
  0x64   : > { %p2085_p6 = scmp.ne.s32.totalorder %s2080_s26, 0 }
  0x65   : > { %s244_s9 = sand.u32 (!%p2085_p6), 1, %s1787_s23   ;;  %s1883_s30 = sand.u32 (!%p2085_p6), 1, %s1628_s16  }
  0x66   : > { %242 = sbr.rel (%p2085_p6) target bundleno = 409 (0x199), region = 36  ;;  %s1156_s5 = sshll.u32 (!%p2085_p6), %s1883_s30, 7 }
  0x67   : > { %s245_s7 = scalar_lea.sflag (!%p2085_p6), [#allocation4], %s244_s9  ;;  %s1886_s14 = scalar_lea.vmem (!%p2085_p6), [#allocation3], %s1156_s5 }
  0x68   : > { %p2086_p13 = scmp.ne.s32.totalorder (!%p2085_p6), %s2077_s6, 0 }
  0x6d   : > { %1607 = dma.done.wait (%p2086_p13), %s245_s7, 2048  }
  0x6e   : > { %1609 = vsyncadd (%p2086_p13), %s245_s7, 4294965248  ;;  %p2087_p10 = scmp.eq.s32.totalorder %s1787_s23, 0 }
  0x70   : > { %1611 = dma.done.wait (%p2087_p10), [#allocation7], 1024   ;;  %p2088_p1 = pmov %p2087_p10 }
  0x71   : > { %s1896_s11 = scalar_lea.vmem [#allocation8], %s1156_s5 }
  0x72   : > { %1613 = vsyncadd (%p2088_p1), [#allocation7], 4294966272 }
  0x73   : > { %1615 = dma.done.wait (%p2086_p13), %s245_s7, 2048  }
  0x74   : > { %1617 = vsyncadd (%p2086_p13), %s245_s7, 4294965248  ;;  %v1442_v0 = vld [vmem:[#allocation6] sm:$0xff]   ;;  %v1443_v1 = vld [vmem:[#allocation6 + $0x8] sm:$0xff]   ;;  %s1159_s26 = sshll.u32 %s1883_s30, 8  ;;  %s1192_s29 = sshll.u32 %s1636_s18, 12 }
  0x75   : > { %1296 = vmatprep.subr.bf16.mxu0 %v1442_v0  ;;  %1344 = vmatprep.subr.bf16.mxu1 %v1442_v0  ;;  %v1444_v2 = vld [vmem:[#allocation6 + $0x10] sm:$0xff]   ;;  %v1445_v3 = vld [vmem:[#allocation6 + $0x18] sm:$0xff]   ;;  %v1450_v4 = vld [vmem:[%s1886_s14] sm:$0xff]   ;;  %s1942_s25 = scalar_lea.vmem [#allocation9], %s1159_s26  ;;  %s2007_s22 = scalar_lea.hbm %s2068_s4, %s1192_s29 }
  0x76   : > { %1297 = vmatpush3.bf16.msra.mxu0 %v1442_v0  ;;  %1352 = vmatpush3.bf16.msra.mxu1 %v1442_v0  ;;  %v1451_v5 = vld [vmem:[%s1886_s14 + $0x40] sm:$0xff]   ;;  %v1447_v7 = vld [vmem:[#allocation6 + $0x28] sm:$0xff]   ;;  %v1448_v8 = vld [vmem:[#allocation6 + $0x30] sm:$0xff]   ;;  %s1029_s12 = sshll.u32 %s1942_s25, 4  ;;  %s1016_s10 = scalar_lea.sflag [#allocation5], %s1883_s30  ;;  %s2009_s12 = int_to_ptr.vmem [resolvable:$true] %s1029_s12 }
  0x77   : > { %1298 = vmatprep.subr.bf16.mxu0 %v1443_v1  ;;  %1345 = vmatprep.subr.bf16.mxu1 %v1443_v1  ;;  %v1446_v6 = vld [vmem:[#allocation6 + $0x20] sm:$0xff]   ;;  %v1449_v9 = vld [vmem:[#allocation6 + $0x38] sm:$0xff]   ;;  %v1452_v10 = vld [vmem:[%s1886_s14 + $0x8] sm:$0xff]   ;;  %s1554_s24 = scalar_lea.vmem %s2009_s12, 4096  ;;  %p2089_p2 = scmp.ne.s32.totalorder %s2078_s28, 0 }
  0x78   : > { %1312 = vmatprep.mubr.bf16.mxu0 %v1450_v4  ;;  %1328 = vmatprep.mubr.bf16.mxu1 %v1451_v5  ;;  %v1453_v11 = vld [vmem:[%s1886_s14 + $0x48] sm:$0xff]   ;;  %v1454_v12 = vld [vmem:[%s1886_s14 + $0x10] sm:$0xff]   ;;  %v1456_v14 = vld [vmem:[%s1886_s14 + $0x18] sm:$0xff]   ;;  %p1555_p7 = scmp.ne.s32.totalorder %s2009_s12, %s1554_s24  ;;  %s1651_s9 = smov [#allocation9]  }
  0x79   : > { %v1455_v13 = vld [vmem:[%s1886_s14 + $0x50] sm:$0xff]   ;;  %v1457_v15 = vld [vmem:[%s1886_s14 + $0x58] sm:$0xff]   ;;  %v1458_v16 = vld [vmem:[%s1886_s14 + $0x20] sm:$0xff]   ;;  %s1558_s5 = sshll.u32 %s1651_s9, 4  ;;  %s1559_s5 = int_to_ptr.vmem [resolvable:$false] %s1558_s5 }
  0x7a   : > { %1299 = vmatpush3.bf16.msra.mxu0 %v1443_v1  ;;  %1353 = vmatpush3.bf16.msra.mxu1 %v1443_v1  ;;  %v1459_v17 = vld [vmem:[%s1886_s14 + $0x60] sm:$0xff]   ;;  %v1460_v18 = vld [vmem:[%s1886_s14 + $0x28] sm:$0xff]   ;;  %v1462_v20 = vld [vmem:[%s1886_s14 + $0x30] sm:$0xff]   ;;  %p1556_p12 = pnand %p1555_p7, %p2089_p2  ;;  %s1560_s7 = scalar_lea.vmem %s1559_s5, 8192 }
  0x7b   : > { %1300 = vmatprep.subr.bf16.mxu0 %v1444_v2  ;;  %1346 = vmatprep.subr.bf16.mxu1 %v1444_v2  ;;  %v1461_v19 = vld [vmem:[%s1886_s14 + $0x68] sm:$0xff]   ;;  %v1463_v21 = vld [vmem:[%s1886_s14 + $0x70] sm:$0xff]   ;;  %v1464_v22 = vld [vmem:[%s1886_s14 + $0x38] sm:$0xff]   ;;  %p1561_p4 = scmp.lt.s32.totalorder %s2009_s12, %s1559_s5  ;;  %p1562_p3 = scmp.lt.s32.totalorder %s1560_s7, %s1554_s24 }
  0x7c   : > { %v1465_v23 = vld [vmem:[%s1886_s14 + $0x78] sm:$0xff]   ;;  %v1257_v24 = vld [vmem:[%s1896_s11 + $0x8] sm:$0xff]   ;;  %v1194_v26 = vld [vmem:[%s1896_s11] sm:$0xff]   ;;  %p1557_p0 = pneg %p1556_p12 }
  0x7d   : > { %v1265_v25 = vld [vmem:[%s1896_s11 + $0x48] sm:$0xff]   ;;  %v1264_v27 = vld [vmem:[%s1896_s11 + $0x40] sm:$0xff]   ;;  %v1199_v29 = vunpack.c.l.bf16 %v1257_v24  ;;  %v1195_v33 = vunpack.c.l.bf16 %v1194_v26  ;;  %v1200_v39 = vunpack.c.h.bf16 %v1257_v24  ;;  %v1196_v45 = vunpack.c.h.bf16 %v1194_v26  ;;  %v1259_v57 = vld [vmem:[%s1896_s11 + $0x18] sm:$0xff]   ;;  %p1563_p5 = por %p1562_p3, %p1561_p4 }
  0x7e   : > { %1301 = vmatpush3.bf16.msra.mxu0 %v1444_v2  ;;  %1354 = vmatpush3.bf16.msra.mxu1 %v1444_v2  ;;  %v1925_v28 = vld [vmem:[%s2066_s2] ss:$0 sm:$0xff]  ;;  %v1231_v30 = vunpack.c.l.bf16 %v1265_v25  ;;  %v1227_v34 = vunpack.c.l.bf16 %v1264_v27  ;;  %v1232_v40 = vunpack.c.h.bf16 %v1265_v25  ;;  %v1228_v46 = vunpack.c.h.bf16 %v1264_v27  ;;  %v1267_v58 = vld [vmem:[%s1896_s11 + $0x58] sm:$0xff]   ;;  %v1258_v63 = vld [vmem:[%s1896_s11 + $0x10] sm:$0xff]  }
  0x7f   : > { %1302 = vmatprep.subr.bf16.mxu0 %v1445_v3  ;;  %1347 = vmatprep.subr.bf16.mxu1 %v1445_v3  ;;  %v1266_v0 = vld [vmem:[%s1896_s11 + $0x50] sm:$0xff]   ;;  %v1204_v25 = vunpack.c.h.bf16 %v1258_v63  ;;  %p1564_p11 = pnand %p1563_p5, %p1557_p0 }
  0x80   : > { %v1236_v26 = vunpack.c.h.bf16 %v1266_v0 }
  0x82   : > { %1303 = vmatpush3.bf16.msra.mxu0 %v1445_v3  ;;  %1355 = vmatpush3.bf16.msra.mxu1 %v1445_v3 }
  0x83   : > { %1304 = vmatprep.subr.bf16.mxu0 %v1446_v6  ;;  %1348 = vmatprep.subr.bf16.mxu1 %v1446_v6 }
  0x86   : > { %1305 = vmatpush3.bf16.msra.mxu0 %v1446_v6  ;;  %1356 = vmatpush3.bf16.msra.mxu1 %v1446_v6 }
  0x87   : > { %1306 = vmatprep.subr.bf16.mxu0 %v1447_v7  ;;  %1349 = vmatprep.subr.bf16.mxu1 %v1447_v7 }
  0x8a   : > { %1307 = vmatpush3.bf16.msra.mxu0 %v1447_v7  ;;  %1357 = vmatpush3.bf16.msra.mxu1 %v1447_v7  ;;  %v1207_v7 = vunpack.c.l.bf16 %v1259_v57 }
  0x8b   : > { %1308 = vmatprep.subr.bf16.mxu0 %v1448_v8  ;;  %1350 = vmatprep.subr.bf16.mxu1 %v1448_v8 }
  0x8e   : > { %1309 = vmatpush3.bf16.msra.mxu0 %v1448_v8  ;;  %1358 = vmatpush3.bf16.msra.mxu1 %v1448_v8  ;;  %v1239_v8 = vunpack.c.l.bf16 %v1267_v58 }
  0x8f   : > { %1310 = vmatprep.subr.bf16.mxu0 %v1449_v9  ;;  %1351 = vmatprep.subr.bf16.mxu1 %v1449_v9 }
  0x92   : > { %1311 = vmatpush3.bf16.msra.mxu0 %v1449_v9  ;;  %1359 = vmatpush3.bf16.msra.mxu1 %v1449_v9 }
  0x95   : > { %1313 = vmatmul.mubr.bf16.vlgmr.msra.gmra.mrb[0].mxu0 %v1452_v10  ;;  %1329 = vmatmul.mubr.bf16.vlgmr.msra.gmra.mrb[0].mxu1 %v1453_v11 }
  0x96   : > { %1316 = vmatprep.mubr.bf16.mxu0 %v1454_v12  ;;  %1332 = vmatprep.mubr.bf16.mxu1 %v1455_v13  ;;  %v1203_v13 = vunpack.c.l.bf16 %v1258_v63 }
  0x9d   : > { %1317 = vmatmul.mubr.bf16.gmra.mrb[4].mxu0 %v1456_v14  ;;  %1333 = vmatmul.mubr.bf16.gmra.mrb[4].mxu1 %v1457_v15  ;;  %v1235_v14 = vunpack.c.l.bf16 %v1266_v0 }
  0x9e   : > { %1320 = vmatprep.mubr.bf16.mxu0 %v1458_v16  ;;  %1336 = vmatprep.mubr.bf16.mxu1 %v1459_v17 }
  0xa5   : > { %1321 = vmatmul.mubr.bf16.gmra.mrb[8].mxu0 %v1460_v18  ;;  %1337 = vmatmul.mubr.bf16.gmra.mrb[8].mxu1 %v1461_v19  ;;  %v1208_v19 = vunpack.c.h.bf16 %v1259_v57 }
  0xa6   : > { %1324 = vmatprep.mubr.bf16.mxu0 %v1462_v20  ;;  %1340 = vmatprep.mubr.bf16.mxu1 %v1463_v21  ;;  %v1240_v20 = vunpack.c.h.bf16 %v1267_v58 }
  0xad   : > { %1325 = vmatmul.mubr.bf16.gmra.mrb[12].mxu0 %v1464_v22  ;;  %1341 = vmatmul.mubr.bf16.gmra.mrb[12].mxu1 %v1465_v23 }
 0x168   : > { %v1314_v31 = vpop.f32.mrb[0].mxu0  ;;  %v1330_v32 = vpop.f32.mrb[0].mxu1 }
 0x169   : > { %v825_v35 = vadd.f32 %v1314_v31, %v1925_v28  ;;  %v841_v36 = vadd.f32 %v1330_v32, %v1925_v28  ;;  %v590_v37 = vpop.f32.mrb[1].mxu0  ;;  %v654_v38 = vpop.f32.mrb[1].mxu1 }
 0x16a   : > { %v823_v41 = vadd.f32 %v1925_v28, %v590_v37  ;;  %v839_v42 = vadd.f32 %v1925_v28, %v654_v38  ;;  %v1315_v43 = vpop.f32.mrb[2].mxu0  ;;  %v1331_v44 = vpop.f32.mrb[2].mxu1  ;;  %v1261_v38 = vld [vmem:[%s1896_s11 + $0x28] sm:$0xff]  }
 0x16b   : > { %v921_v47 = vadd.f32 %v1199_v29, %v825_v35  ;;  %v937_v48 = vadd.f32 %v1231_v30, %v841_v36  ;;  %v826_v49 = vadd.f32 %v1315_v43, %v1925_v28  ;;  %v842_v50 = vadd.f32 %v1331_v44, %v1925_v28  ;;  %v593_v51 = vpop.f32.mrb[3].mxu0  ;;  %v657_v52 = vpop.f32.mrb[3].mxu1  ;;  %v1260_v44 = vld [vmem:[%s1896_s11 + $0x20] sm:$0xff]  }
 0x16c   : > { %v919_v53 = vadd.f32 %v1195_v33, %v823_v41  ;;  %v935_v54 = vadd.f32 %v1227_v34, %v839_v42  ;;  %v824_v55 = vadd.f32 %v1925_v28, %v593_v51  ;;  %v840_v56 = vadd.f32 %v1925_v28, %v657_v52 }
 0x16d   : > { %v953_v59 = vmax.f32 %v921_v47, 0.0  ;;  %v969_v60 = vmax.f32 %v937_v48, 0.0  ;;  %v922_v61 = vadd.f32 %v1200_v39, %v826_v49  ;;  %v938_v62 = vadd.f32 %v1232_v40, %v842_v50  ;;  %v1269_v39 = vld [vmem:[%s1896_s11 + $0x68] sm:$0xff]  }
 0x16e   : > { %v951_v1 = vmax.f32 %v919_v53, 0.0  ;;  %v967_v2 = vmax.f32 %v935_v54, 0.0  ;;  %v920_v3 = vadd.f32 %v1196_v45, %v824_v55  ;;  %v936_v4 = vadd.f32 %v1228_v46, %v840_v56  ;;  %v1268_v45 = vld [vmem:[%s1896_s11 + $0x60] sm:$0xff]  }
 0x16f   : > { %985 = vst [vmem:[%s1942_s25 + $0x10] sm:$0xff] %v953_v59  ;;  %1001 = vst [vmem:[%s1942_s25 + $0x90] sm:$0xff] %v969_v60  ;;  %v954_v5 = vmax.f32 %v922_v61, 0.0  ;;  %v970_v6 = vmax.f32 %v938_v62, 0.0  ;;  %v1215_v52 = vunpack.c.l.bf16 %v1261_v38  ;;  %v1247_v53 = vunpack.c.l.bf16 %v1269_v39 }
 0x170   : > { %983 = vst [vmem:[%s1942_s25] sm:$0xff] %v951_v1  ;;  %999 = vst [vmem:[%s1942_s25 + $0x80] sm:$0xff] %v967_v2  ;;  %v952_v9 = vmax.f32 %v920_v3, 0.0  ;;  %v968_v10 = vmax.f32 %v936_v4, 0.0  ;;  %v1318_v11 = vpop.f32.mrb[4].mxu0  ;;  %v1334_v12 = vpop.f32.mrb[4].mxu1  ;;  %v1211_v58 = vunpack.c.l.bf16 %v1260_v44  ;;  %v1243_v59 = vunpack.c.l.bf16 %v1268_v45 }
 0x171   : > { %986 = vst [vmem:[%s1942_s25 + $0x18] sm:$0xff] %v954_v5  ;;  %1002 = vst [vmem:[%s1942_s25 + $0x98] sm:$0xff] %v970_v6  ;;  %v829_v15 = vadd.f32 %v1318_v11, %v1925_v28  ;;  %v845_v16 = vadd.f32 %v1334_v12, %v1925_v28  ;;  %v606_v17 = vpop.f32.mrb[5].mxu0  ;;  %v670_v18 = vpop.f32.mrb[5].mxu1  ;;  %v1216_v0 = vunpack.c.h.bf16 %v1261_v38  ;;  %v1248_v1 = vunpack.c.h.bf16 %v1269_v39 }
 0x172   : > { %984 = vst [vmem:[%s1942_s25 + $0x8] sm:$0xff] %v952_v9  ;;  %1000 = vst [vmem:[%s1942_s25 + $0x88] sm:$0xff] %v968_v10  ;;  %v827_v21 = vadd.f32 %v1925_v28, %v606_v17  ;;  %v843_v22 = vadd.f32 %v1925_v28, %v670_v18  ;;  %v1319_v23 = vpop.f32.mrb[6].mxu0  ;;  %v1335_v24 = vpop.f32.mrb[6].mxu1  ;;  %v1212_v6 = vunpack.c.h.bf16 %v1260_v44  ;;  %v1263_v18 = vld [vmem:[%s1896_s11 + $0x38] sm:$0xff]  }
 0x173   : > { %v925_v27 = vadd.f32 %v1207_v7, %v829_v15  ;;  %v941_v29 = vadd.f32 %v1239_v8, %v845_v16  ;;  %v830_v30 = vadd.f32 %v1319_v23, %v1925_v28  ;;  %v846_v31 = vadd.f32 %v1335_v24, %v1925_v28  ;;  %v609_v32 = vpop.f32.mrb[7].mxu0  ;;  %v673_v33 = vpop.f32.mrb[7].mxu1  ;;  %v1262_v24 = vld [vmem:[%s1896_s11 + $0x30] sm:$0xff]  }
 0x174   : > { %v923_v34 = vadd.f32 %v1203_v13, %v827_v21  ;;  %v939_v35 = vadd.f32 %v1235_v14, %v843_v22  ;;  %v828_v36 = vadd.f32 %v1925_v28, %v609_v32  ;;  %v844_v37 = vadd.f32 %v1925_v28, %v673_v33 }
 0x175   : > { %v957_v40 = vmax.f32 %v925_v27, 0.0  ;;  %v973_v41 = vmax.f32 %v941_v29, 0.0  ;;  %v926_v42 = vadd.f32 %v1208_v19, %v830_v30  ;;  %v942_v43 = vadd.f32 %v1240_v20, %v846_v31  ;;  %v1271_v19 = vld [vmem:[%s1896_s11 + $0x78] sm:$0xff]  }
 0x176   : > { %v955_v46 = vmax.f32 %v923_v34, 0.0  ;;  %v971_v47 = vmax.f32 %v939_v35, 0.0  ;;  %v924_v48 = vadd.f32 %v1204_v25, %v828_v36  ;;  %v940_v49 = vadd.f32 %v1236_v26, %v844_v37  ;;  %v1270_v25 = vld [vmem:[%s1896_s11 + $0x70] sm:$0xff]  }
 0x177   : > { %989 = vst [vmem:[%s1942_s25 + $0x30] sm:$0xff] %v957_v40  ;;  %1005 = vst [vmem:[%s1942_s25 + $0xb0] sm:$0xff] %v973_v41  ;;  %v958_v50 = vmax.f32 %v926_v42, 0.0  ;;  %v974_v51 = vmax.f32 %v942_v43, 0.0  ;;  %v1244_v7 = vunpack.c.h.bf16 %v1268_v45  ;;  %v1223_v33 = vunpack.c.l.bf16 %v1263_v18 }
 0x178   : > { %987 = vst [vmem:[%s1942_s25 + $0x20] sm:$0xff] %v955_v46  ;;  %1003 = vst [vmem:[%s1942_s25 + $0xa0] sm:$0xff] %v971_v47  ;;  %v956_v54 = vmax.f32 %v924_v48, 0.0  ;;  %v972_v55 = vmax.f32 %v940_v49, 0.0  ;;  %v1322_v56 = vpop.f32.mrb[8].mxu0  ;;  %v1338_v57 = vpop.f32.mrb[8].mxu1  ;;  %v1255_v34 = vunpack.c.l.bf16 %v1271_v19  ;;  %v1219_v39 = vunpack.c.l.bf16 %v1262_v24 }
 0x179   : > { %990 = vst [vmem:[%s1942_s25 + $0x38] sm:$0xff] %v958_v50  ;;  %1006 = vst [vmem:[%s1942_s25 + $0xb8] sm:$0xff] %v974_v51  ;;  %v833_v60 = vadd.f32 %v1322_v56, %v1925_v28  ;;  %v849_v61 = vadd.f32 %v1338_v57, %v1925_v28  ;;  %v622_v62 = vpop.f32.mrb[9].mxu0  ;;  %v686_v63 = vpop.f32.mrb[9].mxu1  ;;  %v1251_v40 = vunpack.c.l.bf16 %v1270_v25  ;;  %v1224_v45 = vunpack.c.h.bf16 %v1263_v18 }
 0x17a   : > { %988 = vst [vmem:[%s1942_s25 + $0x28] sm:$0xff] %v956_v54  ;;  %1004 = vst [vmem:[%s1942_s25 + $0xa8] sm:$0xff] %v972_v55  ;;  %v831_v2 = vadd.f32 %v1925_v28, %v622_v62  ;;  %v847_v3 = vadd.f32 %v1925_v28, %v686_v63  ;;  %v1323_v4 = vpop.f32.mrb[10].mxu0  ;;  %v1339_v5 = vpop.f32.mrb[10].mxu1  ;;  %v1256_v46 = vunpack.c.h.bf16 %v1271_v19  ;;  %v1220_v51 = vunpack.c.h.bf16 %v1262_v24 }
 0x17b   : > { %v929_v8 = vadd.f32 %v1215_v52, %v833_v60  ;;  %v945_v9 = vadd.f32 %v1247_v53, %v849_v61  ;;  %v834_v10 = vadd.f32 %v1323_v4, %v1925_v28  ;;  %v850_v11 = vadd.f32 %v1339_v5, %v1925_v28  ;;  %v625_v12 = vpop.f32.mrb[11].mxu0  ;;  %v689_v13 = vpop.f32.mrb[11].mxu1 }
 0x17c   : > { %v927_v14 = vadd.f32 %v1211_v58, %v831_v2  ;;  %v943_v15 = vadd.f32 %v1243_v59, %v847_v3  ;;  %v832_v16 = vadd.f32 %v1925_v28, %v625_v12  ;;  %v848_v17 = vadd.f32 %v1925_v28, %v689_v13 }
 0x17d   : > { %v961_v20 = vmax.f32 %v929_v8, 0.0  ;;  %v977_v21 = vmax.f32 %v945_v9, 0.0  ;;  %v930_v22 = vadd.f32 %v1216_v0, %v834_v10  ;;  %v946_v23 = vadd.f32 %v1248_v1, %v850_v11 }
 0x17e   : > { %v959_v26 = vmax.f32 %v927_v14, 0.0  ;;  %v975_v27 = vmax.f32 %v943_v15, 0.0  ;;  %v928_v29 = vadd.f32 %v1212_v6, %v832_v16  ;;  %v944_v30 = vadd.f32 %v1244_v7, %v848_v17 }
 0x17f   : > { %993 = vst [vmem:[%s1942_s25 + $0x50] sm:$0xff] %v961_v20  ;;  %1009 = vst [vmem:[%s1942_s25 + $0xd0] sm:$0xff] %v977_v21  ;;  %v962_v31 = vmax.f32 %v930_v22, 0.0  ;;  %v978_v32 = vmax.f32 %v946_v23, 0.0  ;;  %v1252_v52 = vunpack.c.h.bf16 %v1270_v25 }
 0x180   : > { %991 = vst [vmem:[%s1942_s25 + $0x40] sm:$0xff] %v959_v26  ;;  %1007 = vst [vmem:[%s1942_s25 + $0xc0] sm:$0xff] %v975_v27  ;;  %v960_v35 = vmax.f32 %v928_v29, 0.0  ;;  %v976_v36 = vmax.f32 %v944_v30, 0.0  ;;  %v1326_v37 = vpop.f32.mrb[12].mxu0  ;;  %v1342_v38 = vpop.f32.mrb[12].mxu1 }
 0x181   : > { %994 = vst [vmem:[%s1942_s25 + $0x58] sm:$0xff] %v962_v31  ;;  %1010 = vst [vmem:[%s1942_s25 + $0xd8] sm:$0xff] %v978_v32  ;;  %v837_v41 = vadd.f32 %v1326_v37, %v1925_v28  ;;  %v853_v42 = vadd.f32 %v1342_v38, %v1925_v28  ;;  %v638_v43 = vpop.f32.mrb[13].mxu0  ;;  %v702_v44 = vpop.f32.mrb[13].mxu1 }
 0x182   : > { %992 = vst [vmem:[%s1942_s25 + $0x48] sm:$0xff] %v960_v35  ;;  %1008 = vst [vmem:[%s1942_s25 + $0xc8] sm:$0xff] %v976_v36  ;;  %v835_v47 = vadd.f32 %v1925_v28, %v638_v43  ;;  %v851_v48 = vadd.f32 %v1925_v28, %v702_v44  ;;  %v1327_v49 = vpop.f32.mrb[14].mxu0  ;;  %v1343_v50 = vpop.f32.mrb[14].mxu1 }
 0x183   : > { %v933_v53 = vadd.f32 %v1223_v33, %v837_v41  ;;  %v949_v54 = vadd.f32 %v1255_v34, %v853_v42  ;;  %v838_v55 = vadd.f32 %v1327_v49, %v1925_v28  ;;  %v854_v56 = vadd.f32 %v1343_v50, %v1925_v28  ;;  %v641_v57 = vpop.f32.mrb[15].mxu0  ;;  %v705_v58 = vpop.f32.mrb[15].mxu1 }
 0x184   : > { %v931_v59 = vadd.f32 %v1219_v39, %v835_v47  ;;  %v947_v60 = vadd.f32 %v1251_v40, %v851_v48  ;;  %v836_v61 = vadd.f32 %v1925_v28, %v641_v57  ;;  %v852_v62 = vadd.f32 %v1925_v28, %v705_v58 }
 0x185   : > { %v965_v63 = vmax.f32 %v933_v53, 0.0  ;;  %v981_v0 = vmax.f32 %v949_v54, 0.0  ;;  %v934_v1 = vadd.f32 %v1224_v45, %v838_v55  ;;  %v950_v2 = vadd.f32 %v1256_v46, %v854_v56 }
 0x186   : > { %v963_v3 = vmax.f32 %v931_v59, 0.0  ;;  %v979_v4 = vmax.f32 %v947_v60, 0.0  ;;  %v932_v5 = vadd.f32 %v1220_v51, %v836_v61  ;;  %v948_v6 = vadd.f32 %v1252_v52, %v852_v62 }
 0x187   : > { %997 = vst [vmem:[%s1942_s25 + $0x70] sm:$0xff] %v965_v63  ;;  %1013 = vst [vmem:[%s1942_s25 + $0xf0] sm:$0xff] %v981_v0  ;;  %v966_v28 = vmax.f32 %v934_v1, 0.0  ;;  %v982_v7 = vmax.f32 %v950_v2, 0.0 }
 0x188   : > { %995 = vst [vmem:[%s1942_s25 + $0x60] sm:$0xff] %v963_v3  ;;  %1011 = vst [vmem:[%s1942_s25 + $0xe0] sm:$0xff] %v979_v4  ;;  %v964_v8 = vmax.f32 %v932_v5, 0.0  ;;  %v980_v9 = vmax.f32 %v948_v6, 0.0 }
 0x189   : > { %998 = vst [vmem:[%s1942_s25 + $0x78] sm:$0xff] %v966_v28  ;;  %1014 = vst [vmem:[%s1942_s25 + $0xf8] sm:$0xff] %v982_v7 }
 0x18a   : > { %996 = vst [vmem:[%s1942_s25 + $0x68] sm:$0xff] %v964_v8  ;;  %1012 = vst [vmem:[%s1942_s25 + $0xe8] sm:$0xff] %v980_v9 }
 0x18b   : > { %1567 = shalt.err (!%p1564_p11)
}
 0x18c   : > { %s1568_s14 = scalar_lea.hbm %s2007_s22, 4096  ;;  %s1572_s6 = scalar_lea.hbm %s2068_s4, 8192 }
 0x18d   : > { %p1569_p9 = scmp.ne.s32.totalorder %s2007_s22, %s1568_s14  ;;  %p1573_p13 = scmp.lt.u32.totalorder %s2007_s22, %s2068_s4 }
 0x18e   : > { %p1574_p10 = scmp.lt.u32.totalorder %s1572_s6, %s1568_s14  ;;  %p1576_p7 = scmp.lt.u32.totalorder %s1568_s14, %s2007_s22 }
 0x18f   : > { %p1570_p8 = pnand %p1569_p9, %p2089_p2 }
 0x190   : > { %p1575_p1 = por %p1574_p10, %p1573_p13 }
 0x191   : > { %p1571_p6 = pneg %p1570_p8 }
 0x192   : > { %p1577_p12 = por %p1576_p7, %p1575_p1 }
 0x194   : > { %p1578_p0 = pnand %p1577_p12, %p1571_p6 }
 0x196   : > { %1581 = shalt.err (!%p1578_p0)
}
 0x197   : > { %s1652_s29 = smov 128   ;;  %s1653_s18 = smov 8  }
 0x198   : > { %1368 = dma.vmem_to_hbm [thread:$0]  (%p2089_p2), %s2009_s12, 4096, %s2007_s22, %s1016_s10, %s1652_s29, %s1652_s29, %s1653_s18  }
 0x199 PF: > { %s1044_s13 = sand.u32 1, %s1624_s15   ;;  %p2090_p4 = scmp.ne.s32.totalorder %s2079_s8, 0 }
 0x19a   : > { %p2091_p3 = scmp.ge.s32.totalorder %s1644_s20, 2  ;;  %s1045_s24 = scalar_lea.sflag [#allocation5], %s1044_s13 }
 0x19c   : > { %p1382_p5 = pnand %p2091_p3, %p2090_p4 }
 0x19e   : > { %1619 = dma.done.wait (!%p1382_p5), %s1045_s24, 4096  }
 0x19f   : > { %1621 = vsyncadd (!%p1382_p5), %s1045_s24, 4294963200  ;;  %s21_s20 = sadd.s32 1, %s1644_s20   ;;  %s2092_s15 = smov %s1628_s16 }
 0x1a0   : > { %p18_p11 = scmp.ge.s32.totalorder %s21_s20, 4   ;;  %s2093_s16 = smov %s1632_s17 }
 0x1a1   : > { %s2094_s17 = smov %s1730_s27  ;;  %s2095_s18 = smov %s1640_s19 }
 0x1a2   : > { %s2096_s19 = smov %s2098_s21  ;;  %20 = sbr.rel (!%p18_p11) target bundleno = 7 (0x7), region = 105 }
 0x1a9   :  { %1050 = vsyncpa [#allocation4], 1 }
 0x1aa   :  { %1052 = vsyncpa [#allocation4 + $0x1], 1 }
 0x1ab   :  { %1053 = vsyncpa [#allocation7], 1 }
 0x1ac   :  { %1054 = vsyncpa [#allocation5], 1 }
 0x1ad   :  { %1056 = vsyncpa [#allocation5 + $0x1], 1 }

</bundles_post_ra>
